<compile_context>
chip_gen: v5e
topology: v5e:2x2
jax: 0.10.0
libtpu: 0.0.40
codegen_flags: <defaults>
</compile_context>

<pallas_src>
import functools

import jax
import jax.numpy as jnp
from jax.experimental import pallas as pl
from jax.experimental.pallas import tpu as pltpu


def _dwconv_kernel(x_ref, w_ref, b_ref, o_ref, buf_ref, *, head_dim, kernel_size):
    """One (row-block, seq-tile) step of the causal depthwise conv.

    x_ref / o_ref: (gr, Lt) with Lt = ts*D
    w_ref:         (K, Lt)  fp32, pre-tiled per lane (channel = lane % D)
    b_ref:         (1, Lt)  fp32
    buf_ref:       (gr, (K-1)*D + Lt) fp32 scratch = [carried tail | tile]
    """
    D = head_dim
    K = kernel_size
    halo = (K - 1) * D
    gr, Lt = x_ref.shape

    # First seq tile of every row block: positions before t=0 read zero.
    @pl.when(pl.program_id(1) == 0)
    def _():
        buf_ref[:, :halo] = jnp.zeros((gr, halo), jnp.float32)

    # Stage the current tile right after the carried (K-1)-position tail.
    buf_ref[:, halo:] = x_ref[...].astype(jnp.float32)

    # Tap j looks back (K-1-j) positions == a static slice at lane offset j*D.
    acc = b_ref[...]
    for j in range(K):
        acc = acc + buf_ref[:, j * D:j * D + Lt] * w_ref[j:j + 1]
    o_ref[...] = acc.astype(o_ref.dtype)

    # Carry the last (K-1) positions of this tile into the next seq step.
    tail = buf_ref[:, Lt:Lt + halo]
    buf_ref[:, :halo] = tail


def _vmem_budget():
    """(target fp32 working-block bytes, scoped vmem_limit_bytes) per generation."""
    try:
        cap = pltpu.get_tpu_info().vmem_capacity_bytes
    except Exception:
        cap = None
    if cap is not None and cap >= 100 * 1024 * 1024:    # v5e / v6e: 128 MiB VMEM
        return 6 * 1024 * 1024, 64 * 1024 * 1024
    if cap is not None and cap >= 48 * 1024 * 1024:     # v7x: 64 MiB physical
        return 2 * 1024 * 1024, 48 * 1024 * 1024
    return 2 * 1024 * 1024, 32 * 1024 * 1024            # unknown: stay conservative


def _choose_tiling(R, S, D, itemsize, target_bytes):
    """Pick (row block gr, seq tile ts).

    gr: native-sublane multiple (8 fp32 / 16 bf16 / 32 int8), capped so the
        'parallel' row axis has >= 2 blocks whenever R allows (v7x megacore).
    ts: divisor of S with a 128-aligned lane width (or ts == S), the largest
        whose fp32 working block gr*ts*D*4 fits the per-generation budget.
    """
    sublane = max(8, 32 // max(1, itemsize))
    if R <= sublane:
        gr = R                                          # single full-dim row block
    elif R < 2 * sublane:
        gr = sublane                                    # 1 full + 1 partial block
    else:
        gr = max(sublane, ((R // 2) // sublane) * sublane)

    def lane_ok(ts):
        return ts == S or (ts * D) % 128 == 0           # (8,128) BlockSpec rule

    ts = None
    for cand in range(S, 0, -1):                        # prefer the biggest tile
        if S % cand or not lane_ok(cand):
            continue
        if gr * cand * D * 4 <= target_bytes:
            ts = cand
            break
    if ts is None:
        # Even the smallest legal seq tile blows the budget at this gr: shrink
        # gr to the sublane minimum and take the smallest legal seq tile.
        gr = R if R <= sublane else sublane
        ts = next((c for c in range(1, S + 1) if S % c == 0 and lane_ok(c)), S)
    return gr, ts


def spatial_depthwise_conv(x, weight, bias, kernel_size=3):
    """x: (B, heads, seq_len, head_dim); weight: (head_dim, K); bias: (head_dim,)."""
    B, H, S, D = x.shape
    K = kernel_size
    # kernel_size == 1 would make the PyTorch module crop everything; require K >= 2.
    assert K >= 2, "kernel_size must be >= 2"
    assert weight.shape == (D, K) and bias.shape == (D,)

    R = B * H                      # independent rows, one per (batch, head)
    L = S * D                      # lanes: seq folded with head_dim (d fastest)
    x2 = x.reshape(R, L)           # copy-free reshape

    target_bytes, vmem_limit = _vmem_budget()
    gr, ts = _choose_tiling(R, S, D, x.dtype.itemsize, target_bytes)
    Lt = ts * D
    halo = (K - 1) * D
    grid = (pl.cdiv(R, gr), S // ts)

    # Per-tap weights / bias: transposed, lane-tiled, cast to fp32 once at
    # trace time (constant across all grid steps).  No causal masking needed:
    # causality is handled by the zeroed tail at the first seq tile.
    w2 = jnp.tile(weight.astype(jnp.float32).T, (1, ts))              # (K, Lt)
    b2 = jnp.tile(bias.astype(jnp.float32).reshape(1, D), (1, ts))    # (1, Lt)

    kernel = functools.partial(_dwconv_kernel, head_dim=D, kernel_size=K)

    out2 = pl.pallas_call(
        kernel,
        out_shape=jax.ShapeDtypeStruct((R, L), x.dtype),
        grid_spec=pltpu.PrefetchScalarGridSpec(
            num_scalar_prefetch=0,
            grid=grid,
            in_specs=[
                pl.BlockSpec((gr, Lt), lambda i, j: (i, j)),
                pl.BlockSpec((K, Lt), lambda i, j: (0, 0)),
                pl.BlockSpec((1, Lt), lambda i, j: (0, 0)),
            ],
            out_specs=pl.BlockSpec((gr, Lt), lambda i, j: (i, j)),
            scratch_shapes=[pltpu.VMEM((gr, halo + Lt), jnp.float32)],
        ),
        compiler_params=pltpu.CompilerParams(
            # Row blocks are fully independent (v7x megacore sharding); the seq
            # axis carries the (K-1)-position tail and must run in order.
            dimension_semantics=("parallel", "arbitrary"),
            vmem_limit_bytes=vmem_limit,
        ),
        cost_estimate=pl.CostEstimate(
            flops=2 * K * R * L,
            transcendentals=0,
            bytes_accessed=2 * R * L * x.dtype.itemsize + (K + 1) * Lt * 4,
        ),
    )(x2, w2, b2)

    return out2.reshape(B, H, S, D)


def _reference(x, weight, bias, kernel_size=3):
    """Pure-JAX reference of the PyTorch forward (causal depthwise conv)."""
    B, H, S, D = x.shape
    K = kernel_size
    out = jnp.zeros((B, H, S, D), jnp.float32) + bias.astype(jnp.float32)[None, None, None, :]
    xf = x.astype(jnp.float32)
    for j in range(K):
        shift = K - 1 - j
        shifted = jnp.pad(xf, ((0, 0), (0, 0), (shift, 0), (0, 0)))[:, :, :S, :]
        out = out + shifted * weight[:, j].astype(jnp.float32)[None, None, None, :]
    return out.astype(x.dtype)


if __name__ == "__main__":
    B, heads, seq_len, head_dim = 2, 8, 16, 32
    K = 3

    key = jax.random.PRNGKey(0)
    kx, kw, kb = jax.random.split(key, 3)

    x = jax.random.normal(kx, (B, heads, seq_len, head_dim), dtype=jnp.float32)
    # Parameter shapes match nn.Conv1d(head_dim, head_dim, K, groups=head_dim):
    # weight (head_dim, 1, K) -> squeezed to (head_dim, K); bias (head_dim,)
    bound = 1.0 / (K ** 0.5)
    weight = jax.random.uniform(kw, (head_dim, K), minval=-bound, maxval=bound, dtype=jnp.float32)
    bias = jax.random.uniform(kb, (head_dim,), minval=-bound, maxval=bound, dtype=jnp.float32)

    out = spatial_depthwise_conv(x, weight, bias, kernel_size=K)
    out = jax.block_until_ready(out)

    ref = _reference(x, weight, bias, kernel_size=K)
    if not jnp.allclose(out, ref, atol=1e-5, rtol=1e-5):
        raise AssertionError("Pallas kernel does not match reference")

    print("KERNEL_OK")
</pallas_src>

<mosaic_0001>
module attributes {stable_mosaic.version = 11 : i64} {
  func.func @_dwconv_kernel(%arg0: i32, %arg1: i32, %arg2: memref<8x512xf32, #tpu.memory_space<vmem>>, %arg3: memref<3x512xf32, #tpu.memory_space<vmem>>, %arg4: memref<1x512xf32, #tpu.memory_space<vmem>>, %arg5: memref<8x512xf32, #tpu.memory_space<vmem>>, %arg6: memref<8x576xf32, #tpu.memory_space<vmem>>) attributes {dimension_semantics = [#tpu.dimension_semantics<parallel>, #tpu.dimension_semantics<arbitrary>], iteration_bounds = array<i64: 2, 1>, scalar_prefetch = 0 : i64, scratch_operands = 1 : i64, tpu.core_type = #tpu.core_type<tc>, window_params = [{transform_indices = @transform_0, window_bounds = array<i64: 8, 512>}, {pipeline_mode = #tpu.pipeline_mode<synchronous>, transform_indices = @transform_1, window_bounds = array<i64: 3, 512>}, {pipeline_mode = #tpu.pipeline_mode<synchronous>, transform_indices = @transform_2, window_bounds = array<i64: 1, 512>}, {transform_indices = @transform_3, window_bounds = array<i64: 8, 512>}]} {
    %c0_i32 = arith.constant 0 : i32
    %0 = arith.cmpi eq, %arg1, %c0_i32 : i32
    %1 = arith.extui %0 : i1 to i32
    %c0_i32_0 = arith.constant 0 : i32
    %2 = arith.cmpi ne, %1, %c0_i32_0 : i32
    scf.if %2 {
      %cst = arith.constant 0.000000e+00 : f32
      %25 = vector.broadcast %cst : f32 to vector<8x64xf32>
      %c0_19 = arith.constant 0 : index
      %c0_20 = arith.constant 0 : index
      %26 = vector.load %arg6[%c0_19, %c0_20] : memref<8x576xf32, #tpu.memory_space<vmem>>, vector<8x64xf32>
      tpu.vector_store %arg6[%c0_19, %c0_20], %25 {strides = array<i32>} : memref<8x576xf32, #tpu.memory_space<vmem>>, vector<8x64xf32>,
    } else {
    }
    %c0 = arith.constant 0 : index
    %c0_1 = arith.constant 0 : index
    %3 = vector.load %arg2[%c0, %c0_1] : memref<8x512xf32, #tpu.memory_space<vmem>>, vector<8x512xf32>
    %c0_2 = arith.constant 0 : index
    %c64 = arith.constant 64 : index
    %4 = vector.load %arg6[%c0_2, %c64] : memref<8x576xf32, #tpu.memory_space<vmem>>, vector<8x512xf32>
    tpu.vector_store %arg6[%c0_2, %c64], %3 {strides = array<i32>} : memref<8x576xf32, #tpu.memory_space<vmem>>, vector<8x512xf32>,
    %c0_3 = arith.constant 0 : index
    %c0_4 = arith.constant 0 : index
    %5 = vector.load %arg4[%c0_3, %c0_4] : memref<1x512xf32, #tpu.memory_space<vmem>>, vector<1x512xf32>
    %c0_5 = arith.constant 0 : index
    %c0_6 = arith.constant 0 : index
    %6 = vector.load %arg6[%c0_5, %c0_6] : memref<8x576xf32, #tpu.memory_space<vmem>>, vector<8x512xf32>
    %c0_7 = arith.constant 0 : index
    %c0_8 = arith.constant 0 : index
    %7 = vector.load %arg3[%c0_7, %c0_8] : memref<3x512xf32, #tpu.memory_space<vmem>>, vector<1x512xf32>
    %8 = vector.broadcast %7 : vector<1x512xf32> to vector<8x512xf32>
    %9 = arith.mulf %6, %8 : vector<8x512xf32>
    %10 = vector.broadcast %5 : vector<1x512xf32> to vector<8x512xf32>
    %11 = arith.addf %10, %9 : vector<8x512xf32>
    %c0_9 = arith.constant 0 : index
    %c32 = arith.constant 32 : index
    %12 = vector.load %arg6[%c0_9, %c32] : memref<8x576xf32, #tpu.memory_space<vmem>>, vector<8x512xf32>
    %c1 = arith.constant 1 : index
    %c0_10 = arith.constant 0 : index
    %13 = vector.load %arg3[%c1, %c0_10] : memref<3x512xf32, #tpu.memory_space<vmem>>, vector<1x512xf32>
    %14 = vector.broadcast %13 : vector<1x512xf32> to vector<8x512xf32>
    %15 = arith.mulf %12, %14 : vector<8x512xf32>
    %16 = arith.addf %11, %15 : vector<8x512xf32>
    %c0_11 = arith.constant 0 : index
    %c64_12 = arith.constant 64 : index
    %17 = vector.load %arg6[%c0_11, %c64_12] : memref<8x576xf32, #tpu.memory_space<vmem>>, vector<8x512xf32>
    %c2 = arith.constant 2 : index
    %c0_13 = arith.constant 0 : index
    %18 = vector.load %arg3[%c2, %c0_13] : memref<3x512xf32, #tpu.memory_space<vmem>>, vector<1x512xf32>
    %19 = vector.broadcast %18 : vector<1x512xf32> to vector<8x512xf32>
    %20 = arith.mulf %17, %19 : vector<8x512xf32>
    %21 = arith.addf %16, %20 : vector<8x512xf32>
    %c0_14 = arith.constant 0 : index
    %c0_15 = arith.constant 0 : index
    %22 = vector.load %arg5[%c0_14, %c0_15] : memref<8x512xf32, #tpu.memory_space<vmem>>, vector<8x512xf32>
    tpu.vector_store %arg5[%c0_14, %c0_15], %21 {strides = array<i32>} : memref<8x512xf32, #tpu.memory_space<vmem>>, vector<8x512xf32>,
    %c0_16 = arith.constant 0 : index
    %c512 = arith.constant 512 : index
    %23 = vector.load %arg6[%c0_16, %c512] : memref<8x576xf32, #tpu.memory_space<vmem>>, vector<8x64xf32>
    %c0_17 = arith.constant 0 : index
    %c0_18 = arith.constant 0 : index
    %24 = vector.load %arg6[%c0_17, %c0_18] : memref<8x576xf32, #tpu.memory_space<vmem>>, vector<8x64xf32>
    tpu.vector_store %arg6[%c0_17, %c0_18], %23 {strides = array<i32>} : memref<8x576xf32, #tpu.memory_space<vmem>>, vector<8x64xf32>,
    return
  }
  func.func @transform_0(%arg0: i32, %arg1: i32) -> (i32, i32) {
    %c0_i32 = arith.constant 0 : i32
    return %arg0, %arg1 : i32, i32
  }
  func.func @transform_1(%arg0: i32, %arg1: i32) -> (i32, i32) {
    %c0_i32 = arith.constant 0 : i32
    %c0_i32_0 = arith.constant 0 : i32
    %c0_i32_1 = arith.constant 0 : i32
    return %c0_i32, %c0_i32_0 : i32, i32
  }
  func.func @transform_2(%arg0: i32, %arg1: i32) -> (i32, i32) {
    %c0_i32 = arith.constant 0 : i32
    %c0_i32_0 = arith.constant 0 : i32
    %c0_i32_1 = arith.constant 0 : i32
    return %c0_i32, %c0_i32_0 : i32, i32
  }
  func.func @transform_3(%arg0: i32, %arg1: i32) -> (i32, i32) {
    %c0_i32 = arith.constant 0 : i32
    return %arg0, %arg1 : i32, i32
  }
}

</mosaic_0001>

<bundles_post_ra>
// kernel: tpu_custom_call.1
= control target key start
LH: loop header
LB: loop body
LE: loop exit
PB: predicated region body
PF: predicated region fallthrough
CT: control target
= control target key end

     0   :  { %8 = vsyncpa [#allocation4], 0  ;;  %s1041_s0 = inlined_call_operand.hbm [shape: f32[16,512], index: 0, kind: input, shape index: {}]   ;;  %s1042_s1 = inlined_call_operand.hbm [shape: f32[3,512], index: 1, kind: input, shape index: {}]   ;;  %s1043_s2 = inlined_call_operand.hbm [shape: f32[1,512], index: 2, kind: input, shape index: {}]   ;;  %s1044_s3 = inlined_call_operand.hbm [shape: f32[16,512], index: 3, kind: output, shape index: {}]  }
   0x1   :  { %10 = vsyncpa [#allocation4 + $0x1], 0 }
   0x2   :  { %11 = vsyncpa [#allocation7], 0 }
   0x3   :  { %12 = vsyncpa [#allocation5], 0 }
   0x4   :  { %14 = vsyncpa [#allocation5 + $0x1], 0  ;;  %s860_s12 = smov 0   ;;  %s862_s13 = smov 0  }
   0x5   :  { %s864_s14 = smov 0   ;;  %s866_s15 = smov 0  }
   0x6   :  { %s868_s16 = smov 0   ;;  %s870_s17 = smov 0  }
   0x7 LB: > { %s548_s18 = sadd.s32 4294967295, %s832_s17   ;;  %s549_s19 = sadd.s32 4294967294, %s832_s17   ;;  %s832_s17 = sphi %s870_s17, %s20_s17   ;;  %s828_s16 = sphi %s868_s16, %s1054_s16   ;;  %s824_s15 = sphi %s866_s15, %s1053_s15   ;;  %s820_s14 = sphi %s864_s14, %s1052_s14   ;;  %s816_s13 = sphi %s862_s13, %s1051_s13   ;;  %s812_s12 = sphi %s860_s12, %s1050_s12  }
   0x8   : > { %p54_p0 = scmp.ne.s32.totalorder %s816_s13, %s812_s12  ;;  %p894_p1 = scmp.eq.s32.totalorder %s548_s18, 0 }
   0x9   : > { %p128_p2 = scmp.eq.s32.totalorder %s549_s19, 1  ;;  %p550_p4 = scmp.ge.s32.totalorder %s832_s17, 1 }
   0xa   : > { %p900_p3 = por %p894_p1, %p54_p0  ;;  %p135_p6 = scmp.lt.s32.totalorder %s832_s17, 3 }
   0xb   : > { %p905_p5 = por %p128_p2, %p54_p0  ;;  %s147_s25 = sshll.u32 %s1042_s1, 4  ;;  %s148_s25 = int_to_ptr.hbm [resolvable:$true] %s147_s25 }
   0xc   : > { %p913_p7 = pnand %p550_p4, %p135_p6  ;;  %p553_p8 = scmp.ge.s32.totalorder %s832_s17, 2 }
   0xd   : > { %s834_s27 = smov [#allocation6]   ;;  %s159_s4 = sshll.u32 %s1043_s2, 4  ;;  %s160_s4 = int_to_ptr.hbm [resolvable:$true] %s159_s4 }
   0xe   : > { %p581_p9 = pneg %p913_p7  ;;  %s149_s28 = sshll.u32 %s834_s27, 4  ;;  %s150_s28 = int_to_ptr.vmem [resolvable:$true] %s149_s28 }
   0xf   : > { %s835_s5 = smov [#allocation8]   ;;  %p122_p11 = scmp.eq.s32.totalorder %s548_s18, 1 }
  0x10   : > { %p582_p10 = pnand %p581_p9, %p894_p1  ;;  %s161_s6 = sshll.u32 %s835_s5, 4  ;;  %s162_s6 = int_to_ptr.vmem [resolvable:$true] %s161_s6 }
  0x11   : > { %s32_s7 = sadd.s32 1, %s828_s16  ;;  %s41_s8 = sadd.s32 1, %s820_s14 }
  0x12   : > { %584 = dma.hbm_to_vmem [thread:$0]  (!%p582_p10), %s148_s25, 256, %s150_s28, [#allocation7]  }
  0x13   : > { %587 = dma.hbm_to_vmem [thread:$0]  (!%p582_p10), %s160_s4, 64, %s162_s6, [#allocation7]  }
  0x14   : > { %p34_p12 = scmp.ge.s32.totalorder %s32_s7, 2  ;;  %p48_p13 = scmp.ne.s32.totalorder %s820_s14, %s816_s13 }
  0x15   : > { %p49_p0 = scmp.eq.s32.totalorder %s832_s17, 0  ;;  %p598_p4 = scmp.lt.s32.totalorder %s832_s17, 2 }
  0x16   : > { %s1056_s7 = smov (%p34_p12, %s32_s7), 0  ;;  %p932_p2 = por %p122_p11, %p48_p13 }
  0x17   : > { %s36_s10 = ssub.s32 %s828_s16, %s1056_s7  ;;  %s172_s11 = sand.u32 1, %s820_s14  }
  0x18   : > { %p39_p6 = scmp.eq.s32.totalorder %s36_s10, 0  ;;  %p50_p9 = por %p49_p0, %p48_p13 }
  0x19   : > { %s554_s19 = sshll.u32 %s172_s11, 5  ;;  %s567_s18 = sshll.u32 %s828_s16, 5 }
  0x1a   : > { %s942_s23 = scalar_select %p39_p6, %s820_s14, %s41_s8  }
  0x1b   : > { %s183_s27 = scalar_lea.hbm %s1041_s0, %s567_s18  ;;  %s176_s29 = scalar_lea.vmem [#allocation3], %s554_s19 }
  0x1c   : > { %s185_s28 = sshll.u32 %s183_s27, 4  ;;  %s187_s30 = sshll.u32 %s176_s29, 4  ;;  %s186_s28 = int_to_ptr.hbm [resolvable:$true] %s185_s28  ;;  %s188_s30 = int_to_ptr.vmem [resolvable:$true] %s187_s30 }
  0x1d   : > { %p589_p10 = pnand %p598_p4, %p50_p9  ;;  %s173_s4 = scalar_lea.sflag [#allocation4], %s172_s11 }
  0x1e   : > { %196 = sbr.rel (%p913_p7) target bundleno = 311 (0x137), region = 32  ;;  %s952_s5 = sand.u32 (!%p913_p7), 1, %s816_s13  }
  0x1f   : > { %591 = dma.hbm_to_vmem [thread:$0]  (!%p589_p10), %s186_s28, 512, %s188_s30, %s173_s4  }
  0x20   : > { %s558_s6 = sshll.u32 (!%p913_p7), %s952_s5, 5  ;;  %s199_s8 = scalar_lea.sflag (!%p913_p7), [#allocation4], %s952_s5 }
  0x21   : > { %s202_s10 = scalar_lea.vmem (!%p913_p7), [#allocation3], %s558_s6 }
  0x23   : > { %799 = dma.done.wait (%p900_p3), %s199_s8, 512  }
  0x24   : > { %801 = vsyncadd (%p900_p3), %s199_s8, 4294966784 }
  0x25   : > { %803 = dma.done.wait (%p894_p1), [#allocation7], 320  }
  0x26   : > { %805 = vsyncadd (%p894_p1), [#allocation7], 4294966976  ;;  %v246_v0 = vld [vmem:[%s202_s10 + $0x10] sm:$0xff]  ;;  %v244_v1 = vld [vmem:[%s202_s10] sm:$0xff]  ;;  %s836_s26 = smov 64   ;;  %s837_s11 = smov 32  }
  0x27   : > { %256 = vrot.lane.b32.xlu1 %v246_v0, %s836_s26  ;;  %252 = vrot.lane.b32.xlu0 %v244_v1, %s836_s26  ;;  %v309_v2 = vld [vmem:[#allocation6 + $0x1] ss:$4 sm:$0xf]  ;;  %v247_v4 = vld [vmem:[%s202_s10 + $0x18] sm:$0xff]  ;;  %vm242_vm0 = vcmask 523264   ;;  %v838_v14 = vmov 0.0  }
  0x28   : > { %v311_v3 = vperm.slane %v309_v2, 0  ;;  %v245_v5 = vld [vmem:[%s202_s10 + $0x8] sm:$0xff]  ;;  %v312_v6 = vperm.slane %v309_v2, 1  ;;  %v314_v7 = vperm.slane %v309_v2, 3  ;;  %v313_v8 = vperm.slane %v309_v2, 2  ;;  %243 = vst.msk [vmem:[#allocation2] sm:$0xff] %vm242_vm0, %v838_v14 }
  0x29   : > { %v366_v9 = vld [vmem:[#allocation6 + $0x2] ss:$4 sm:$0xf]  ;;  %vm269_vm1 = vcmask 1048064   ;;  %s839_s20 = smov 96   ;;  %vm323_vm2 = vcmask 261120  }
  0x2a   : > { %315 = vrot.lane.b32.xlu2 %v311_v3, %s837_s11  ;;  %v368_v10 = vperm.slane %v366_v9, 0  ;;  %v370_v11 = vperm.slane %v366_v9, 2  ;;  %v369_v12 = vperm.slane %v366_v9, 1  ;;  %v371_v13 = vperm.slane %v366_v9, 3  ;;  %v275_v53 = vld [vmem:[#allocation8] sm:$0xf] }
  0x2b   : > { %v280_v50 = vld [vmem:[#allocation6] ss:$4 sm:$0xf]  ;;  %v295_v55 = vperm.slane %v275_v53, 0  ;;  %vm352_vm3 = vcmask 785408   ;;  %v297_v63 = vperm.slane %v275_v53, 2 }
  0x2c   : > { %v282_v52 = vperm.slane %v280_v50, 0  ;;  %v284_v58 = vperm.slane %v280_v50, 2  ;;  %v283_v59 = vperm.slane %v280_v50, 1  ;;  %v285_v60 = vperm.slane %v280_v50, 3  ;;  %s568_s21 = sshll.u32 %s824_s15, 5  ;;  %s235_s19 = scalar_lea.vmem [#allocation9], %s558_s6 }
  0x2d   : > { %v296_v0 = vperm.slane %v275_v53, 1  ;;  %s440_s25 = scalar_lea.hbm %s1044_s3, %s568_s21  ;;  %s442_s15 = sshll.u32 %s235_s19, 4  ;;  %s443_s15 = int_to_ptr.vmem [resolvable:$true] %s442_s15 }
  0x2e   : > { %s444_s27 = sshll.u32 %s440_s25, 4  ;;  %s427_s28 = scalar_lea.sflag [#allocation5], %s952_s5  ;;  %s445_s27 = int_to_ptr.hbm [resolvable:$true] %s444_s27 }
  0x2f   : > { %258 = vrot.lane.b32.xlu1 %v247_v4, %s836_s26  ;;  %254 = vrot.lane.b32.xlu0 %v245_v5, %s836_s26  ;;  %s760_s29 = sshra.s32 %s445_s27, 4  ;;  %s766_s8 = scalar_lea.hbm %s1044_s3, 64  ;;  %s761_s29 = int_to_ptr.hbm [resolvable:$true] %s760_s29 }
  0x30   : > { %s762_s30 = scalar_lea.hbm %s761_s29, 32  ;;  %p767_p11 = scmp.lt.s32.totalorder %s761_s29, %s1044_s3 }
  0x31   : > { %p763_p1 = scmp.ne.s32.totalorder %s761_s29, %s762_s30  ;;  %p768_p12 = scmp.lt.s32.totalorder %s766_s8, %s762_s30 }
  0x32   : > { %317 = vrot.lane.b32.xlu2 %v312_v6, %s837_s11 }
  0x33   : > { %p764_p3 = pnand %p763_p1, %p932_p2  ;;  %p769_p13 = por %p768_p12, %p767_p11 }
  0x35   : > { %p765_p7 = pneg %p764_p3 }
  0x37   : > { %321 = vrot.lane.b32.xlu1 %v314_v7, %s837_s11  ;;  %319 = vrot.lane.b32.xlu0 %v313_v8, %s837_s11  ;;  %v298_v8 = vperm.slane %v275_v53, 3  ;;  %p770_p0 = pnand %p769_p13, %p765_p7 }
  0x3a   : > { %372 = vrot.lane.b32.xlu2 %v368_v10, %s836_s26 }
  0x3f   : > { %376 = vrot.lane.b32.xlu1 %v370_v11, %s836_s26  ;;  %374 = vrot.lane.b32.xlu0 %v369_v12, %s836_s26 }
  0x42   : > { %378 = vrot.lane.b32.xlu2 %v371_v13, %s836_s26 }
  0x84   : > { %v316_v15 = vpop.permute.xlu2 %315 }
  0x8c   : > { %v318_v16 = vpop.permute.xlu2 %317 }
  0x8d   : > { %v324_v36 = vsel %vm323_vm2, %v316_v15, %v318_v16 }
  0x94   : > { %v373_v19 = vpop.permute.xlu2 %372 }
  0x99   : > { %v257_v17 = vpop.permute.xlu1 %256  ;;  %v253_v18 = vpop.permute.xlu0 %252 }
  0x9a   : > { %270 = vst.msk [vmem:[#allocation2] sm:$0xff] %vm269_vm1, %v253_v18 }
  0x9c   : > { %v379_v37 = vpop.permute.xlu2 %378 }
  0xa1   : > { %v276_v20 = vld [vmem:[#allocation2] sm:$0xff]  ;;  %v259_v21 = vpop.permute.xlu1 %258  ;;  %v255_v22 = vpop.permute.xlu0 %254 }
  0xa2   : > { %v388_v23 = vmul.f32 %v373_v19, %v276_v20  ;;  %v976_v24 = vsel %vm242_vm0, %v257_v17, %v259_v21  ;;  %274 = vst.msk [vmem:[#allocation2 + $0x20] sm:$0xff] %vm242_vm0, %v259_v21  ;;  %v261_v25 = vsel %vm242_vm0, %v253_v18, %v255_v22  ;;  %v262_v26 = vsel %vm242_vm0, %v255_v22, %v257_v17 }
  0xa3   : > { %v332_v27 = vmul.f32 %v316_v15, %v276_v20  ;;  %v333_v42 = vmul.f32 %v324_v36, %v261_v25  ;;  %v290_v56 = vmul.f32 %v282_v52, %v276_v20  ;;  %v292_v3 = vmul.f32 %v284_v58, %v262_v26 }
  0xa4   : > { %398 = vrot.lane.b32.xlu2 %v388_v23, %s836_s26  ;;  %v291_v4 = vmul.f32 %v283_v59, %v261_v25  ;;  %v293_v7 = vmul.f32 %v285_v60, %v976_v24 }
  0xa5   : > { %342 = vrot.lane.b32.xlu0 %v332_v27, %s839_s20  ;;  %v303_v62 = vadd.f32 %v295_v55, %v290_v56  ;;  %v305_v12 = vadd.f32 %v297_v63, %v292_v3 }
  0xa6   : > { %v304_v14 = vadd.f32 %v296_v0, %v291_v4  ;;  %v306_v15 = vadd.f32 %v298_v8, %v293_v7 }
  0xa9   : > { %v424_v28 = vld [vmem:[#allocation2 + $0x20] sm:$0xff]  ;;  %v322_v29 = vpop.permute.xlu1 %321  ;;  %v320_v30 = vpop.permute.xlu0 %319 }
  0xaa   : > { %425 = vst.msk [vmem:[#allocation2] sm:$0xff] %vm242_vm0, %v424_v28  ;;  %v336_v31 = vmul.f32 %v424_v28, %v322_v29  ;;  %v325_v32 = vsel %vm323_vm2, %v318_v16, %v320_v30  ;;  %v326_v33 = vsel %vm323_vm2, %v320_v30, %v322_v29  ;;  %v392_v47 = vmul.f32 %v424_v28, %v379_v37 }
  0xab   : > { %v334_v34 = vmul.f32 %v325_v32, %v262_v26  ;;  %v335_v35 = vmul.f32 %v326_v33, %v976_v24 }
  0xac   : > { %350 = vrot.lane.b32.xlu1 %v336_v31, %s839_s20 }
  0xad   : > { %346 = vrot.lane.b32.xlu2 %v334_v34, %s839_s20  ;;  %348 = vrot.lane.b32.xlu0 %v335_v35, %s839_s20 }
  0xb1   : > { %v377_v38 = vpop.permute.xlu1 %376  ;;  %v375_v39 = vpop.permute.xlu0 %374 }
  0xb2   : > { %v382_v40 = vsel %vm242_vm0, %v377_v38, %v379_v37  ;;  %v380_v41 = vsel %vm242_vm0, %v373_v19, %v375_v39  ;;  %v381_v45 = vsel %vm242_vm0, %v375_v39, %v377_v38 }
  0xb3   : > { %v391_v43 = vmul.f32 %v382_v40, %v976_v24  ;;  %v389_v44 = vmul.f32 %v380_v41, %v261_v25  ;;  %v390_v46 = vmul.f32 %v381_v45, %v262_v26 }
  0xb4   : > { %344 = vrot.lane.b32.xlu1 %v333_v42, %s839_s20 }
  0xb5   : > { %404 = vrot.lane.b32.xlu2 %v391_v43, %s836_s26  ;;  %400 = vrot.lane.b32.xlu0 %v389_v44, %s836_s26 }
  0xbc   : > { %402 = vrot.lane.b32.xlu1 %v390_v46, %s836_s26 }
  0xbd   : > { %406 = vrot.lane.b32.xlu0 %v392_v47, %s836_s26 }
  0xfe   : > { %v399_v49 = vpop.permute.xlu2 %398 }
 0x107   : > { %v347_v57 = vpop.permute.xlu2 %346 }
 0x10f   : > { %v405_v16 = vpop.permute.xlu2 %404 }
 0x117   : > { %v343_v48 = vpop.permute.xlu0 %342 }
 0x11e   : > { %v351_v51 = vpop.permute.xlu1 %350 }
 0x11f   : > { %v349_v54 = vpop.permute.xlu0 %348 }
 0x120   : > { %v355_v10 = vsel %vm352_vm3, %v347_v57, %v349_v54  ;;  %v356_v13 = vsel %vm352_vm3, %v349_v54, %v351_v51 }
 0x121   : > { %v363_v17 = vadd.f32 %v355_v10, %v305_v12  ;;  %v364_v20 = vadd.f32 %v356_v13, %v306_v15 }
 0x126   : > { %v345_v61 = vpop.permute.xlu1 %344 }
 0x127   : > { %v353_v1 = vsel %vm352_vm3, %v343_v48, %v345_v61  ;;  %v401_v2 = vpop.permute.xlu0 %400  ;;  %v354_v11 = vsel %vm352_vm3, %v345_v61, %v347_v57 }
 0x128   : > { %v361_v5 = vadd.f32 %v353_v1, %v303_v62  ;;  %v408_v6 = vsel %vm242_vm0, %v399_v49, %v401_v2  ;;  %v362_v18 = vadd.f32 %v354_v11, %v304_v14 }
 0x12a   : > { %v416_v9 = vadd.f32 %v408_v6, %v361_v5 }
 0x12c   : > { %420 = vst [vmem:[%s235_s19] sm:$0xff] %v416_v9 }
 0x12e   : > { %v403_v19 = vpop.permute.xlu1 %402 }
 0x12f   : > { %v409_v21 = vsel %vm242_vm0, %v401_v2, %v403_v19  ;;  %v410_v22 = vsel %vm242_vm0, %v403_v19, %v405_v16  ;;  %v407_v23 = vpop.permute.xlu0 %406 }
 0x130   : > { %v417_v24 = vadd.f32 %v409_v21, %v362_v18  ;;  %v418_v25 = vadd.f32 %v410_v22, %v363_v17  ;;  %v411_v26 = vsel %vm242_vm0, %v405_v16, %v407_v23 }
 0x131   : > { %v419_v27 = vadd.f32 %v411_v26, %v364_v20 }
 0x132   : > { %421 = vst [vmem:[%s235_s19 + $0x8] sm:$0xff] %v417_v24 }
 0x133   : > { %422 = vst [vmem:[%s235_s19 + $0x10] sm:$0xff] %v418_v25 }
 0x134   : > { %423 = vst [vmem:[%s235_s19 + $0x18] sm:$0xff] %v419_v27 }
 0x135   : > { %773 = shalt.err (!%p770_p0)
}
 0x136   : > { %579 = dma.vmem_to_hbm [thread:$0]  (%p932_p2), %s443_s15, 512, %s445_s27, %s427_s28  }
 0x137 PF: > { %s456_s5 = sand.u32 1, %s812_s12   ;;  %p593_p4 = pnand %p553_p8, %p905_p5 }
 0x138   : > { %s457_s11 = scalar_lea.sflag [#allocation5], %s456_s5 }
 0x139   : > { %p594_p6 = pneg %p593_p4 }
 0x13b   : > { %807 = dma.done.wait (%p594_p6), %s457_s11, 512  }
 0x13c   : > { %809 = vsyncadd (%p594_p6), %s457_s11, 4294966784  ;;  %s20_s17 = sadd.s32 1, %s832_s17   ;;  %s1050_s12 = smov %s816_s13 }
 0x13d   : > { %p17_p9 = scmp.ge.s32.totalorder %s20_s17, 4   ;;  %s1051_s13 = smov %s820_s14 }
 0x13e   : > { %s1052_s14 = smov %s942_s23  ;;  %s1053_s15 = smov %s828_s16 }
 0x13f   : > { %s1054_s16 = smov %s1056_s7  ;;  %19 = sbr.rel (!%p17_p9) target bundleno = 7 (0x7), region = 91 }
 0x144   :  { %463 = vsyncpa [#allocation4], 1 }
 0x145   :  { %465 = vsyncpa [#allocation4 + $0x1], 1 }
 0x146   :  { %466 = vsyncpa [#allocation7], 1 }
 0x147   :  { %467 = vsyncpa [#allocation5], 1 }
 0x148   :  { %469 = vsyncpa [#allocation5 + $0x1], 1 }

</bundles_post_ra>
